<compile_context>
chip_gen: v6e
topology: v6e:2x2x1
jax: 0.10.0
libtpu: 0.0.40
codegen_flags: <defaults>
</compile_context>

<pallas_src>
import math
import functools

import jax
import jax.numpy as jnp
import numpy as np
from jax.experimental import pallas as pl
from jax.experimental.pallas import tpu as pltpu


# ----------------------------------------------------------------------------
# VMEM budgeting (hardware-aware clamp; v7x has 64 MiB, v5e/v6e 128 MiB)
# ----------------------------------------------------------------------------
def _vmem_limit(est_bytes):
    try:
        cap = getattr(pltpu.get_tpu_info(), "vmem_capacity_bytes", 128 << 20)
    except Exception:  # pragma: no cover - conservative fallback
        cap = 128 << 20
    hi = int(cap) * 7 // 8          # leave headroom for double buffering
    return int(min(max(int(est_bytes), 32 << 20), hi))


def _stage_vmem_est(H, W, Cin, Cout, out_itemsize):
    Sp = W + 2
    canvas = (H + 4) * Sp * Cin * 2
    acc = H * Sp * 4 * Cout * 4
    xin = H * W * Cin * 2
    out = 4 * H * W * Cout * out_itemsize
    wgt = 9 * Cin * 4 * Cout * 2
    return 2 * xin + 2 * out + 2 * wgt + 2 * canvas + 3 * acc + (4 << 20)


def _tail_vmem_est(H, W, Cin, C3, C4):
    return (_stage_vmem_est(H, W, Cin, C3, 2)
            + _stage_vmem_est(2 * H, 2 * W, C3, C4, 4))


# ----------------------------------------------------------------------------
# Kernel 1: Linear (BN scale folded into weights) + shift + ReLU
# ----------------------------------------------------------------------------
def _linear_relu_kernel(x_ref, w_ref, shift_ref, o_ref):
    y = jnp.dot(x_ref[...], w_ref[...], preferred_element_type=jnp.float32)
    y = y + shift_ref[...]
    o_ref[...] = jnp.maximum(y, 0.0).astype(o_ref.dtype)


def linear_relu(x, w, shift):
    # x: (N, D) bf16 ; w: (D, P) bf16 (BN scale folded, NHWC-permuted cols)
    N, D = x.shape
    P = w.shape[1]
    # Pad N up to a multiple of 8 (avoids sub-sublane M / masked stores).
    Np = max(8, ((N + 7) // 8) * 8)
    if Np != N:
        x = jnp.concatenate([x, jnp.zeros((Np - N, D), x.dtype)], axis=0)
    # P is always a multiple of 256 for this module (proj = 256*(h/16)*(w/16)).
    if P % 2048 == 0:
        TP = 2048
    elif P % 1024 == 0:
        TP = 1024
    elif P % 512 == 0:
        TP = 512
    else:
        TP = 256
    TN = 256 if (Np % 256 == 0) else Np
    grid = (Np // TN, P // TP)
    out = pl.pallas_call(
        _linear_relu_kernel,
        out_shape=jax.ShapeDtypeStruct((Np, P), jnp.bfloat16),
        grid=grid,
        in_specs=[
            pl.BlockSpec((TN, D), lambda i, j: (i, 0)),
            pl.BlockSpec((D, TP), lambda i, j: (0, j)),
            pl.BlockSpec((1, TP), lambda i, j: (0, j)),
        ],
        out_specs=pl.BlockSpec((TN, TP), lambda i, j: (i, j)),
        compiler_params=pltpu.CompilerParams(
            dimension_semantics=("parallel", "parallel")),
    )(x, w, shift)
    return out[:N] if Np != N else out


# ----------------------------------------------------------------------------
# Phase-folded (sub-pixel) fused upsample-2x + 3x3 conv primitive
#
#   x:      (H, W, Cin) low-res activation (bf16)
#   w_ref:  (9, Cin, 4*Cout) phase-stacked folded weights
#           tap t = s_r*3 + s_c  (low-res source offset + 1)
#           column block p = ry*2 + rx  (output phase)
#   return: (2H, 2W, Cout) float32, pre-shift / pre-activation
#
# The low-res input is zero padded (2 rows top/bottom, 1 col each side) and
# flattened so every tap is one contiguous slice feeding a single
# (H*Sp, Cin) x (Cin, 4*Cout) MXU matmul with f32 accumulation.  The 4 output
# phases are then de-interleaved with cheap slices / concats / reshapes that
# never split the minor (lane) dim.
# ----------------------------------------------------------------------------
def _phase_conv(x, w_ref):
    H, W, Cin = x.shape
    Cout = w_ref.shape[-1] // 4
    Sp = W + 2
    L = H * Sp
    cdt = x.dtype

    # padded LOW-RES canvas (tiny; 4x smaller than the old high-res canvas)
    zc = jnp.zeros((H, 1, Cin), cdt)
    zr = jnp.zeros((2, Sp, Cin), cdt)
    canvas = jnp.concatenate(
        [zr, jnp.concatenate([zc, x, zc], axis=1), zr], axis=0)  # (H+4, Sp, Cin)
    flat = canvas.reshape((H + 4) * Sp, Cin)

    acc = jnp.zeros((L, 4 * Cout), jnp.float32)
    for sr in range(3):
        for sc in range(3):
            off = (sr + 1) * Sp + (sc - 1)
            acc = acc + jnp.dot(flat[off:off + L], w_ref[sr * 3 + sc],
                                preferred_element_type=jnp.float32)

    # drop the pad columns, then de-interleave the 4 phases into (2H, 2W, Cout)
    ao = acc.reshape(H, Sp, 4 * Cout)[:, 1:W + 1]          # (H, W, 4*Cout)
    y00 = ao[:, :, 0 * Cout:1 * Cout]                      # phase (ry=0, rx=0)
    y01 = ao[:, :, 1 * Cout:2 * Cout]                      # phase (0, 1)
    y10 = ao[:, :, 2 * Cout:3 * Cout]                      # phase (1, 0)
    y11 = ao[:, :, 3 * Cout:4 * Cout]                      # phase (1, 1)
    row0 = jnp.concatenate([y00[:, :, None, :], y01[:, :, None, :]],
                           axis=2).reshape(H, 2 * W, Cout)  # even output rows
    row1 = jnp.concatenate([y10[:, :, None, :], y11[:, :, None, :]],
                           axis=2).reshape(H, 2 * W, Cout)  # odd output rows
    y = jnp.concatenate([row0[:, None], row1[:, None]], axis=1)
    return y.reshape(2 * H, 2 * W, Cout)


# ----------------------------------------------------------------------------
# Kernel 2: one decoder stage = phase-folded upsample+conv + BN shift + act
# ----------------------------------------------------------------------------
def _upconv_phase_kernel(x_ref, w_ref, shift_ref, o_ref, *, activation,
                         apply_shift):
    y = _phase_conv(x_ref[0], w_ref)
    if apply_shift:
        y = y + shift_ref[0]
    if activation == "relu":
        y = jnp.maximum(y, 0.0)
    elif activation == "tanh":
        y = jnp.tanh(y)
    elif activation == "none":
        pass
    else:
        raise NotImplementedError(activation)
    o_ref[0] = y.astype(o_ref.dtype)


def upconv2x_3x3(x, w_stack, shift, *, activation, apply_shift,
                 out_dtype=jnp.bfloat16):
    # x: (N, H, W, Cin) bf16 NHWC (low-res); w_stack: (9, Cin, 4*Cout) bf16
    N, H, W, Cin = x.shape
    Cout = w_stack.shape[-1] // 4
    HO, WO = 2 * H, 2 * W
    kern = functools.partial(_upconv_phase_kernel, activation=activation,
                             apply_shift=apply_shift)
    return pl.pallas_call(
        kern,
        out_shape=jax.ShapeDtypeStruct((N, HO, WO, Cout), out_dtype),
        grid=(N,),
        in_specs=[
            pl.BlockSpec((1, H, W, Cin), lambda n: (n, 0, 0, 0)),
            pl.BlockSpec((9, Cin, 4 * Cout), lambda n: (0, 0, 0)),
            pl.BlockSpec((1, Cout), lambda n: (0, 0)),
        ],
        out_specs=pl.BlockSpec((1, HO, WO, Cout), lambda n: (n, 0, 0, 0)),
        compiler_params=pltpu.CompilerParams(
            dimension_semantics=("parallel",),
            vmem_limit_bytes=_vmem_limit(
                _stage_vmem_est(H, W, Cin, Cout,
                                jnp.dtype(out_dtype).itemsize))),
    )(x, w_stack, shift)


# ----------------------------------------------------------------------------
# Kernel 3: fused tail = stage 3 (Cout=32, BN+ReLU) + stage 4 (Cout=4, no BN,
#           output activation), emitting a lane-dense NCHW-flat block.
#           The 32-channel intermediate never leaves VMEM.
# ----------------------------------------------------------------------------
def _fused_tail_kernel(x_ref, w3_ref, shift3_ref, w4_ref, o_ref, *, activation):
    # stage 3: (H, W, 64) -> (2H, 2W, 32)
    y3 = _phase_conv(x_ref[0], w3_ref)
    y3 = jnp.maximum(y3 + shift3_ref[0], 0.0).astype(jnp.bfloat16)
    # stage 4: (2H, 2W, 32) -> (4H, 4W, 4), no BatchNorm on the last conv
    y4 = _phase_conv(y3, w4_ref)
    if activation == "tanh":
        y4 = jnp.tanh(y4)
    elif activation == "none":
        pass
    else:
        raise NotImplementedError(activation)
    HO, WO, C = y4.shape
    # in-VMEM transpose -> lane-dense NCHW-flat (C, HO*WO) store
    o_ref[0] = jnp.transpose(y4.reshape(HO * WO, C)).astype(o_ref.dtype)


def upconv_tail_fused(x, w3_stack, shift3, w4_stack, *, activation,
                      out_dtype=jnp.float32):
    # x: (N, H, W, 64) bf16 NHWC (stage-3 input); output (N, C4, 4H*4W) NCHW-flat
    N, H, W, Cin = x.shape
    C3 = w3_stack.shape[-1] // 4
    C4 = w4_stack.shape[-1] // 4
    HO, WO = 4 * H, 4 * W
    kern = functools.partial(_fused_tail_kernel, activation=activation)
    return pl.pallas_call(
        kern,
        out_shape=jax.ShapeDtypeStruct((N, C4, HO * WO), out_dtype),
        grid=(N,),
        in_specs=[
            pl.BlockSpec((1, H, W, Cin), lambda n: (n, 0, 0, 0)),
            pl.BlockSpec((9, Cin, 4 * C3), lambda n: (0, 0, 0)),
            pl.BlockSpec((1, C3), lambda n: (0, 0)),
            pl.BlockSpec((9, C3, 4 * C4), lambda n: (0, 0, 0)),
        ],
        out_specs=pl.BlockSpec((1, C4, HO * WO), lambda n: (n, 0, 0)),
        compiler_params=pltpu.CompilerParams(
            dimension_semantics=("parallel",),
            vmem_limit_bytes=_vmem_limit(_tail_vmem_est(H, W, Cin, C3, C4))),
    )(x, w3_stack, shift3, w4_stack)


# ----------------------------------------------------------------------------
# Parameter construction (deterministic, synthetic) + kernel/reference views
# ----------------------------------------------------------------------------
def _folded_bn(key, c):
    k1, k2, k3, k4 = jax.random.split(key, 4)
    gamma = 1.0 + 0.1 * jax.random.normal(k1, (c,), jnp.float32)
    beta = 0.1 * jax.random.normal(k2, (c,), jnp.float32)
    mean = 0.1 * jax.random.normal(k3, (c,), jnp.float32)
    var = 1.0 + 0.5 * jax.random.uniform(k4, (c,), jnp.float32)
    scale = gamma / jnp.sqrt(var + 1e-5)
    shift = beta - mean * scale
    return scale, shift


def _phase_stack_weights(wf):
    """HWIO (3,3,Cin,Cout) -> (9, Cin, 4*Cout) sub-pixel phase-stacked weights.

    Nearest-2x upsample followed by a SAME 3x3 conv is equivalent, per output
    phase (ry, rx) in {0,1}^2, to a conv on the LOW-RES input whose tap at
    low-res offset (dr, dc) sums all original taps (a, b) with
    floor((ry+a-1)/2) == dr and floor((rx+b-1)/2) == dc.  Taps a phase never
    reads stay zero; phases are stacked along the output-channel (N) dim.
    """
    w = np.asarray(jnp.asarray(wf, jnp.float32))
    cin, cout = w.shape[2], w.shape[3]
    out = np.zeros((9, cin, 4 * cout), np.float32)
    for ry in range(2):
        for rx in range(2):
            p = ry * 2 + rx
            for a in range(3):
                sr = (ry + a - 1) // 2 + 1          # low-res row offset + 1
                for b in range(3):
                    sc = (rx + b - 1) // 2 + 1      # low-res col offset + 1
                    out[sr * 3 + sc, :, p * cout:(p + 1) * cout] += w[a, b]
    return jnp.asarray(out, jnp.bfloat16)


def init_params(key, d_in, output_shape):
    c_out, h, w = output_shape
    pc, ph, pw = 256, h // 16, w // 16
    proj = pc * ph * pw
    keys = jax.random.split(key, 10)

    kern, ref = {}, {}

    # Linear (d_in -> proj) in PyTorch column order (c-major), BN0 folded.
    w_lin = (1.0 / math.sqrt(d_in)) * jax.random.normal(
        keys[0], (d_in, proj), jnp.float32)
    s0, t0 = _folded_bn(keys[1], proj)
    w_lin_f = (w_lin * s0[None, :]).astype(jnp.bfloat16)
    ref["w_lin"] = w_lin_f
    ref["shift_lin"] = t0.astype(jnp.float32)
    # permute columns so the kernel output is already NHWC-flat (zero cost).
    kern["w_lin"] = (w_lin_f.reshape(d_in, pc, ph, pw)
                     .transpose(0, 2, 3, 1).reshape(d_in, proj))
    kern["shift_lin"] = (t0.reshape(pc, ph, pw).transpose(1, 2, 0)
                         .reshape(1, proj).astype(jnp.float32))

    chans = [256, 128, 64, 32, c_out]
    for i in range(4):
        cin, cout = chans[i], chans[i + 1]
        wk = (1.0 / math.sqrt(cin * 9)) * jax.random.normal(
            keys[2 + 2 * i], (3, 3, cin, cout), jnp.float32)
        if i < 3:
            s, t = _folded_bn(keys[3 + 2 * i], cout)
        else:  # last conv: no BatchNorm in the module
            s = jnp.ones((cout,), jnp.float32)
            t = jnp.zeros((cout,), jnp.float32)
        wf = (wk * s[None, None, None, :]).astype(jnp.bfloat16)  # HWIO, folded
        ref[f"w{i+1}"] = wf
        ref[f"shift{i+1}"] = t.astype(jnp.float32)
        kern[f"w{i+1}"] = _phase_stack_weights(wf)       # (9, cin, 4*cout) bf16
        kern[f"shift{i+1}"] = t.reshape(1, cout).astype(jnp.float32)

    return kern, ref, (pc, ph, pw)


# ----------------------------------------------------------------------------
# Full CnnDecoder forward (Pallas path)
# ----------------------------------------------------------------------------
def cnn_decoder_forward(x, kern, proj_shape, output_shape,
                        output_activation="tanh"):
    b, l, d = x.shape
    c_out, h_out, w_out = output_shape
    pc, ph, pw = proj_shape
    N = b * l

    xf = x.reshape(N, d).astype(jnp.bfloat16)

    # Linear -> (folded BN1d) -> ReLU, output already NHWC-flat
    y = linear_relu(xf, kern["w_lin"], kern["shift_lin"])
    y = y.reshape(N, ph, pw, pc)           # free row-major reshape, no transpose

    # stages 1-2: fused (upsample2x + conv3x3 + BN shift + ReLU), phase-folded
    for i in (1, 2):
        y = upconv2x_3x3(y, kern[f"w{i}"], kern[f"shift{i}"],
                         activation="relu", apply_shift=True)

    # stages 3-4 fused: 32-channel intermediate stays in VMEM, output emitted
    # lane-dense NCHW-flat (C, H*W) directly from the kernel.
    act = "tanh" if output_activation == "tanh" else "none"
    y = upconv_tail_fused(y, kern["w3"], kern["shift3"], kern["w4"],
                          activation=act, out_dtype=jnp.float32)

    return y.reshape(b, l, c_out, h_out, w_out)   # free reshape, already NCHW


# ----------------------------------------------------------------------------
# Pure-JAX (XLA) reference for verification, using the same folded bf16 weights
# ----------------------------------------------------------------------------
def upsample2x_nhwc(x):
    N, H, W, C = x.shape
    x = jnp.broadcast_to(x[:, :, None, :, None, :], (N, H, 2, W, 2, C))
    return x.reshape(N, 2 * H, 2 * W, C)


def reference_forward(x, ref, proj_shape, output_shape,
                      output_activation="tanh"):
    b, l, d = x.shape
    c_out, h_out, w_out = output_shape
    pc, ph, pw = proj_shape
    N = b * l

    xb = x.reshape(N, d).astype(jnp.bfloat16)
    y = jnp.dot(xb, ref["w_lin"], preferred_element_type=jnp.float32)
    y = jnp.maximum(y + ref["shift_lin"][None, :], 0.0).astype(jnp.bfloat16)
    y = y.reshape(N, pc, ph, pw).transpose(0, 2, 3, 1)     # NCHW -> NHWC

    def conv(z, wk):
        return jax.lax.conv_general_dilated(
            z, wk, window_strides=(1, 1), padding="SAME",
            dimension_numbers=("NHWC", "HWIO", "NHWC"),
            preferred_element_type=jnp.float32)

    for i in (1, 2, 3):
        y = upsample2x_nhwc(y)
        y = jnp.maximum(conv(y, ref[f"w{i}"])
                        + ref[f"shift{i}"][None, None, None, :], 0.0)
        y = y.astype(jnp.bfloat16)

    y = upsample2x_nhwc(y)
    y = conv(y, ref["w4"])
    if output_activation == "tanh":
        y = jnp.tanh(y)
    y = jnp.transpose(y, (0, 3, 1, 2))
    return y.reshape(b, l, c_out, h_out, w_out)


if __name__ == "__main__":
    key = jax.random.PRNGKey(0)
    k_x, k_p = jax.random.split(key)

    # Small synthetic config consistent with the module's asserts
    input_shape = [32]            # latent dim
    output_shape = (4, 16, 16)    # (c, h, w); h, w multiples of 16
    b, l = 2, 2

    kern, ref, proj_shape = init_params(k_p, input_shape[0], output_shape)
    x = jax.random.normal(k_x, (b, l, input_shape[0]), jnp.float32)

    out = cnn_decoder_forward(x, kern, proj_shape, output_shape,
                              output_activation="tanh")
    out = jax.block_until_ready(out)
    assert out.shape == (b, l) + output_shape, out.shape

    expect = jax.block_until_ready(
        reference_forward(x, ref, proj_shape, output_shape,
                          output_activation="tanh"))

    # bf16 activations/weights feed the MXU (f32 accumulation) and the phase
    # fold sums bf16 taps before rounding, so compare at a bf16-appropriate
    # tolerance; structural/indexing bugs would show up as O(0.1 - 1) errors.
    np.testing.assert_allclose(np.asarray(out, np.float32),
                               np.asarray(expect, np.float32),
                               rtol=2e-2, atol=2e-2)

    print("KERNEL_OK")
</pallas_src>

<mosaic_0001>
module attributes {stable_mosaic.version = 11 : i64} {
  func.func @_linear_relu_kernel(%arg0: i32, %arg1: i32, %arg2: memref<8x32xbf16, #tpu.memory_space<vmem>>, %arg3: memref<32x256xbf16, #tpu.memory_space<vmem>>, %arg4: memref<1x256xf32, #tpu.memory_space<vmem>>, %arg5: memref<8x256xbf16, #tpu.memory_space<vmem>>) attributes {dimension_semantics = [#tpu.dimension_semantics<parallel>, #tpu.dimension_semantics<parallel>], iteration_bounds = array<i64: 1, 1>, scalar_prefetch = 0 : i64, scratch_operands = 0 : i64, tpu.core_type = #tpu.core_type<tc>, window_params = [{transform_indices = @transform_0, window_bounds = array<i64: 8, 32>}, {transform_indices = @transform_1, window_bounds = array<i64: 32, 256>}, {transform_indices = @transform_2, window_bounds = array<i64: 1, 256>}, {transform_indices = @transform_3, window_bounds = array<i64: 8, 256>}]} {
    %c0 = arith.constant 0 : index
    %c0_0 = arith.constant 0 : index
    %0 = vector.load %arg2[%c0, %c0_0] : memref<8x32xbf16, #tpu.memory_space<vmem>>, vector<8x32xbf16>
    %c0_1 = arith.constant 0 : index
    %c0_2 = arith.constant 0 : index
    %1 = vector.load %arg3[%c0_1, %c0_2] : memref<32x256xbf16, #tpu.memory_space<vmem>>, vector<32x256xbf16>
    %cst = arith.constant dense<0.000000e+00> : vector<8x256xf32>
    %2 = tpu.matmul %0, %1, %cst {dimension_numbers = #tpu.dot_dimension_numbers<[1], [0], [0], [1], [0, 0, 1, 1], [], []>} : vector<8x32xbf16>, vector<32x256xbf16>, vector<8x256xf32> -> vector<8x256xf32>
    %c0_3 = arith.constant 0 : index
    %c0_4 = arith.constant 0 : index
    %3 = vector.load %arg4[%c0_3, %c0_4] : memref<1x256xf32, #tpu.memory_space<vmem>>, vector<1x256xf32>
    %4 = vector.broadcast %3 : vector<1x256xf32> to vector<8x256xf32>
    %5 = arith.addf %2, %4 : vector<8x256xf32>
    %cst_5 = arith.constant 0.000000e+00 : f32
    %6 = vector.broadcast %cst_5 : f32 to vector<8x256xf32>
    %7 = arith.maximumf %5, %6 : vector<8x256xf32>
    %8 = arith.truncf %7 : vector<8x256xf32> to vector<8x256xbf16>
    %c0_6 = arith.constant 0 : index
    %c0_7 = arith.constant 0 : index
    %9 = vector.load %arg5[%c0_6, %c0_7] : memref<8x256xbf16, #tpu.memory_space<vmem>>, vector<8x256xbf16>
    tpu.vector_store %arg5[%c0_6, %c0_7], %8 {strides = array<i32>} : memref<8x256xbf16, #tpu.memory_space<vmem>>, vector<8x256xbf16>,
    return
  }
  func.func @transform_0(%arg0: i32, %arg1: i32) -> (i32, i32) {
    %c0_i32 = arith.constant 0 : i32
    %c0_i32_0 = arith.constant 0 : i32
    return %arg0, %c0_i32 : i32, i32
  }
  func.func @transform_1(%arg0: i32, %arg1: i32) -> (i32, i32) {
    %c0_i32 = arith.constant 0 : i32
    %c0_i32_0 = arith.constant 0 : i32
    return %c0_i32, %arg1 : i32, i32
  }
  func.func @transform_2(%arg0: i32, %arg1: i32) -> (i32, i32) {
    %c0_i32 = arith.constant 0 : i32
    %c0_i32_0 = arith.constant 0 : i32
    return %c0_i32, %arg1 : i32, i32
  }
  func.func @transform_3(%arg0: i32, %arg1: i32) -> (i32, i32) {
    %c0_i32 = arith.constant 0 : i32
    return %arg0, %arg1 : i32, i32
  }
}

</mosaic_0001>

<bundles_post_ra>
// kernel: tpu_custom_call.1
= control target key start
LH: loop header
LB: loop body
LE: loop exit
PB: predicated region body
PF: predicated region fallthrough
CT: control target
= control target key end

     0   :  { %8 = vsyncpa [#allocation3], 0  ;;  %s274_s0 = inlined_call_operand.hbm [shape: bf16[8,32], index: 0, kind: input, shape index: {}]   ;;  %s275_s1 = inlined_call_operand.hbm [shape: bf16[32,256], index: 1, kind: input, shape index: {}]   ;;  %s276_s2 = inlined_call_operand.vmem [shape: f32[1,256], index: 2, kind: input, shape index: {}]   ;;  %s277_s3 = inlined_call_operand.hbm [shape: bf16[8,256], index: 3, kind: output, shape index: {}]  }
   0x1   :  { %9 = vsyncpa [#allocation6], 0 }
   0x2   :  { %10 = vsyncpa [#allocation4], 0  ;;  %s236_s12 = smov [#allocation2]   ;;  %s237_s14 = smov [#allocation5]  }
   0x3   :  { %s17_s13 = sshll.u32 %s236_s12, 4  ;;  %s26_s15 = sshll.u32 %s237_s14, 4  ;;  %s18_s13 = int_to_ptr.vmem [resolvable:$true] %s17_s13  ;;  %s27_s15 = int_to_ptr.vmem [resolvable:$true] %s26_s15 }
   0x4   :  { %s178_s16 = scalar_lea.vmem %s18_s13, 64  ;;  %p183_p1 = scmp.lt.s32.totalorder %s18_s13, %s18_s13 }
   0x5   :  { %p179_p0 = scmp.ne.s32.totalorder %s18_s13, %s178_s16  ;;  %p184_p2 = scmp.lt.s32.totalorder %s178_s16, %s178_s16 }
   0x7   :  { %p185_p3 = por %p184_p2, %p183_p1 }
   0x9   :  { %p186_p4 = pnand %p185_p3, %p179_p0 }
   0xb   :  { %189 = shalt.err (!%p186_p4)
}
   0xc   :  { %20 = dma.hbm_to_vmem [thread:$0]  %s274_s0, 64, %s18_s13, [#allocation3]  }
   0xd   :  { %s198_s19 = scalar_lea.vmem %s27_s15, 512  ;;  %p203_p6 = scmp.lt.s32.totalorder %s27_s15, %s27_s15 }
   0xe   :  { %p199_p5 = scmp.ne.s32.totalorder %s27_s15, %s198_s19  ;;  %p204_p7 = scmp.lt.s32.totalorder %s198_s19, %s198_s19 }
  0x10   :  { %p205_p8 = por %p204_p7, %p203_p6 }
  0x12   :  { %p206_p9 = pnand %p205_p8, %p199_p5 }
  0x14   :  { %209 = shalt.err (!%p206_p9)
}
  0x15   :  { %s238_s20 = smov 128   ;;  %s239_s21 = smov 8  }
  0x16   :  { %32 = dma.hbm_to_vmem [thread:$0]  %s275_s1, 512, %s27_s15, [#allocation6], %s238_s20, %s238_s20, %s239_s21  }
  0x17   :  { %230 = dma.done.wait [#allocation3], 64  }
  0x18   :  { %231 = vsyncadd [#allocation3], 4294967232 }
  0x19   :  { %232 = dma.done.wait [#allocation6], 512  }
  0x1a   :  { %233 = vsyncadd [#allocation6], 4294966784  ;;  %v240_v0 = vmov 0   ;;  %v164_v1 = vld [vmem:[#allocation5 + $0x14] ss:$8 sps:$4 sm:$0xff]   ;;  %vm79_vm0 = vcmask 261120   ;;  %v49_v6 = vlaneseq }
  0x1b   :  { %115 = vmatprep.mubr.bf16.mxu0 %v240_v0  ;;  %v166_v2 = vld [vmem:[#allocation5 + $0x10] ss:$8 sps:$4 sm:$0xff]   ;;  %95 = vmatprep.subr.bf16.mxu0 %v164_v1  ;;  %v167_v3 = vld [vmem:[#allocation5 + $0x4] ss:$8 sps:$4 sm:$0xff]   ;;  %v169_v4 = vld [vmem:[#allocation5] ss:$8 sps:$4 sm:$0xff]  }
  0x1c   :  { %96 = vmatpush1.bf16.msra.mxu0 %v166_v2  ;;  %v42_v5 = vld [vmem:[#allocation2] sm:$0xf]  ;;  %v50_v7 = vshrl.u32 %v49_v6, 7  ;;  %s241_s24 = smov [#allocation7]  }
  0x1d   :  { %97 = vmatprep.subr.bf16.mxu0 %v167_v3  ;;  %v47_v9 = vld [vmem:[%s276_s2] sm:$0x3]  ;;  %s141_s25 = sshll.u32 %s241_s24, 4  ;;  %s142_s25 = int_to_ptr.vmem [resolvable:$true] %s141_s25 }
  0x1e   :  { %v51_v8 = vsub.s32 0, %v50_v7  ;;  %v55_v10 = vsub.s32 1, %v50_v7  ;;  %s210_s26 = scalar_lea.vmem %s142_s25, 128  ;;  %p215_p11 = scmp.lt.s32.totalorder %s142_s25, %s142_s25 }
  0x1f   :  { %p211_p10 = scmp.ne.s32.totalorder %s142_s25, %s210_s26  ;;  %p216_p12 = scmp.lt.s32.totalorder %s210_s26, %s210_s26 }
  0x20   :  { %98 = vmatpush1.bf16.msra.mxu0 %v169_v4  ;;  %v52_v11 = vrot.slane %v47_v9, %v51_v8  ;;  %v56_v12 = vrot.slane %v47_v9, %v55_v10 }
  0x21   :  { %p217_p13 = por %p216_p12, %p215_p11 }
  0x23   :  { %155 = vmatmul.mubr.msk.bf16.vlgmr.msra.gmra.mxu0 %vm79_vm0, %v42_v5  ;;  %p218_p0 = pnand %p217_p13, %p211_p10 }
  0xe3   :  { %v117_v13 = vpop.f32.mrf.mxu0 }
  0xe4   :  { %v118_v14 = vadd.f32 %v117_v13, %v52_v11 }
  0xe5   :  { %v119_v15 = vpop.f32.mrf.mxu0 }
  0xe6   :  { %v120_v16 = vadd.f32 %v119_v15, %v56_v12  ;;  %v124_v18 = vmax.f32 %v118_v14, 0.0 }
  0xe7   :  { %v121_v17 = vpop.f32.mrf.mxu0 }
  0xe8   :  { %v125_v19 = vmax.f32 %v120_v16, 0.0 }
  0xe9   :  { %v122_v20 = vpop.f32.mrf.mxu0 }
  0xea   :  { %v157_v21 = vpack.c.bf16 %v125_v19, %v124_v18 }
  0xec   :  { %134 = vst [vmem:[#allocation7] sm:$0xff] %v157_v21 }
  0xed   :  { %221 = shalt.err (!%p218_p0)
}
  0xee   :  { %144 = dma.vmem_to_hbm [thread:$0]  %s142_s25, 128, %s277_s3, [#allocation4]  }
  0xef   :  { %234 = dma.done.wait [#allocation4], 128  }
  0xf0   :  { %235 = vsyncadd [#allocation4], 4294967168 }
  0xf1   :  { %148 = vsyncpa [#allocation3], 1 }
  0xf2   :  { %149 = vsyncpa [#allocation6], 1 }
  0xf3   :  { %150 = vsyncpa [#allocation4], 1 }

</bundles_post_ra>
